<compile_context>
chip_gen: v6e
topology: v6e:2x2x1
jax: 0.10.0
libtpu: 0.0.40
codegen_flags: <defaults>
</compile_context>

<pallas_src>
import jax
import jax.numpy as jnp
from jax.experimental import pallas as pl
from jax.experimental.pallas import tpu as pltpu

VOCAB = 129
DIM = 2048


def _round_up(x, m):
    return ((x + m - 1) // m) * m


def _split_f32_to_3bf16(x):
    """Split an f32 array into three bf16 terms with x ~= hi + mid + lo
    (residual ~2^-24 relative).  Summing onehot @ {hi, mid, lo} in f32 therefore
    reproduces the original f32 rows."""
    hi = x.astype(jnp.bfloat16)
    r1 = x - hi.astype(jnp.float32)
    mid = r1.astype(jnp.bfloat16)
    r2 = r1 - mid.astype(jnp.float32)
    lo = r2.astype(jnp.bfloat16)
    return hi, mid, lo


# ---------------------------------------------------------------------------
# Small-N path: scalar-prefetch row gather (copy-only kernel, no MXU).
# ---------------------------------------------------------------------------
def _row_gather_kernel(idx_ref, row_ref, out_ref):
    del idx_ref  # only consumed by the index_maps
    out_ref[...] = row_ref[...]


def _embed_small(idx_flat, table_rows):
    n = idx_flat.shape[0]
    dim = table_rows.shape[-1]
    out = pl.pallas_call(
        _row_gather_kernel,
        out_shape=jax.ShapeDtypeStruct((n, 1, dim), table_rows.dtype),
        grid_spec=pltpu.PrefetchScalarGridSpec(
            num_scalar_prefetch=1,
            grid=(n,),
            in_specs=[
                # Data-dependent row fetch: (1, 1, DIM) block at row idx[i].
                pl.BlockSpec((1, 1, dim), lambda i, idx: (idx[i], 0, 0)),
            ],
            out_specs=pl.BlockSpec((1, 1, dim), lambda i, idx: (i, 0, 0)),
        ),
        compiler_params=pltpu.CompilerParams(
            dimension_semantics=("arbitrary",),
        ),
        cost_estimate=pl.CostEstimate(
            flops=0,
            transcendentals=0,
            bytes_accessed=2 * n * dim * 4 + n * 4,
        ),
    )(idx_flat, table_rows)
    return out.reshape(n, dim)


# ---------------------------------------------------------------------------
# Large-N path: bf16 one-hot MXU gather against a resident 3-term bf16 table.
# ---------------------------------------------------------------------------
def _embed_onehot_kernel(idx_ref, hi_ref, mid_ref, lo_ref, out_ref):
    tn = out_ref.shape[0]
    vocab_pad = hi_ref.shape[0]

    idx = idx_ref[...]                                              # (TN, 1) i32
    vocab_iota = jax.lax.broadcasted_iota(jnp.int32, (tn, vocab_pad), 1)
    # One-hot built directly in bf16 (0.0 / 1.0 are exact in bf16).
    onehot = (idx == vocab_iota).astype(jnp.bfloat16)               # (TN, VPAD)

    acc = jnp.dot(onehot, hi_ref[...], preferred_element_type=jnp.float32)
    acc = acc + jnp.dot(onehot, mid_ref[...], preferred_element_type=jnp.float32)
    acc = acc + jnp.dot(onehot, lo_ref[...], preferred_element_type=jnp.float32)
    out_ref[...] = acc.astype(out_ref.dtype)


def _embed_large(idx_flat, hi, mid, lo, tile_rows):
    n = idx_flat.shape[0]
    vocab_pad, dim = hi.shape

    # Pad N only to a multiple of 8 (sublane granularity).  The ragged last
    # grid block is handled by Pallas (clipped writeback), so no tile-sized
    # padding and no full-output out[:n] copy for tile-unaligned N.
    n8 = _round_up(n, 8)
    if n8 != n:
        idx_flat = jnp.pad(idx_flat, (0, n8 - n))
    idx2d = idx_flat.reshape(n8, 1)

    tile = min(tile_rows, n8)
    grid = (pl.cdiv(n8, tile),)
    table_spec = pl.BlockSpec((vocab_pad, dim), lambda i: (0, 0))  # resident

    out = pl.pallas_call(
        _embed_onehot_kernel,
        out_shape=jax.ShapeDtypeStruct((n8, dim), jnp.float32),
        grid_spec=pl.GridSpec(
            grid=grid,
            in_specs=[
                pl.BlockSpec((tile, 1), lambda i: (i, 0)),   # per-tile indices
                table_spec, table_spec, table_spec,          # bf16 table terms
            ],
            out_specs=pl.BlockSpec((tile, dim), lambda i: (i, 0)),
        ),
        compiler_params=pltpu.CompilerParams(
            dimension_semantics=("parallel",),
            # Covers double-buffered (tile, DIM) f32 output + 3 x 1 MiB bf16
            # table terms + in-kernel temporaries on every generation
            # (v5e default scoped limit of ~16 MiB would otherwise be tight).
            vmem_limit_bytes=40 * 1024 * 1024,
        ),
        cost_estimate=pl.CostEstimate(
            flops=2 * 3 * n8 * vocab_pad * dim,
            transcendentals=0,
            bytes_accessed=n8 * dim * 4 + 3 * vocab_pad * dim * 2 + n8 * 4,
        ),
    )(idx2d, hi, mid, lo)

    if n8 != n:
        out = out[:n]   # at most 7 tail rows; only hit for N not a multiple of 8
    return out


class PosL2Embed:
    """JAX/Pallas port of the PyTorch Pos_L2_Embed module (forward only).

    Table preparation (vocab pad to 256 + exact 3-term bf16 split + 3-D row
    view) is hoisted to __init__ so per-call work is just the pallas_call.
    """

    def __init__(self, table, *, tile_rows=512, small_n_threshold=256):
        table = jnp.asarray(table, jnp.float32)
        assert table.shape == (VOCAB, DIM), table.shape
        self.tile_rows = int(tile_rows)
        self.small_n_threshold = int(small_n_threshold)

        # Small-N gather path: row-major 3-D view of the f32 table.
        self.table_rows = table.reshape(VOCAB, 1, DIM)

        # Large-N MXU path: pad vocab to a multiple of 128 (padded rows are
        # zero and never selected), then split into three exact bf16 terms.
        vocab_pad = _round_up(VOCAB, 128)
        table_padded = jnp.pad(table, ((0, vocab_pad - VOCAB), (0, 0)))
        self.table_hi, self.table_mid, self.table_lo = _split_f32_to_3bf16(
            table_padded)

    def __call__(self, position):
        # NOTE: unlike torch.nn.Embedding, out-of-range indices do not raise;
        # the one-hot path yields a zero row and the gather path is undefined.
        orig_shape = position.shape
        flat = position.reshape(-1).astype(jnp.int32)
        n = flat.shape[0]
        if n <= self.small_n_threshold:
            out = _embed_small(flat, self.table_rows)
        else:
            out = _embed_large(flat, self.table_hi, self.table_mid,
                               self.table_lo, self.tile_rows)
        return out.reshape(*orig_shape, DIM)


if __name__ == "__main__":
    key = jax.random.PRNGKey(0)
    k_table, k_pos_small, k_pos_large = jax.random.split(key, 3)

    # nn.Embedding default init: weight ~ N(0, 1).
    table = jax.random.normal(k_table, (VOCAB, DIM), dtype=jnp.float32)
    module = PosL2Embed(table)

    # Primary (module-sized) input: batch=2, seq=8 -> small-N gather path.
    position = jax.random.randint(k_pos_small, (2, 8), 0, VOCAB, dtype=jnp.int32)
    out_small = jax.block_until_ready(module(position))
    ref_small = jnp.take(table, position, axis=0)
    assert out_small.shape == (2, 8, DIM), out_small.shape
    assert jnp.allclose(out_small, ref_small, rtol=1e-6, atol=1e-6), \
        "small-N gather path mismatch vs reference"

    # Larger input to exercise the one-hot MXU path (incl. a partial last tile).
    position_lg = jax.random.randint(k_pos_large, (4, 160), 0, VOCAB,
                                     dtype=jnp.int32)
    out_large = jax.block_until_ready(module(position_lg))
    ref_large = jnp.take(table, position_lg, axis=0)
    assert out_large.shape == (4, 160, DIM), out_large.shape
    assert jnp.allclose(out_large, ref_large, rtol=1e-6, atol=1e-6), \
        "large-N one-hot path mismatch vs reference"

    print("KERNEL_OK")
</pallas_src>

<mosaic_0001>
module attributes {stable_mosaic.version = 11 : i64} {
  func.func @_row_gather_kernel(%arg0: i32, %arg1: memref<16xi32, #tpu.memory_space<smem>>, %arg2: memref<1x1x2048xf32, #tpu.memory_space<vmem>>, %arg3: memref<1x1x2048xf32, #tpu.memory_space<vmem>>) attributes {dimension_semantics = [#tpu.dimension_semantics<arbitrary>], iteration_bounds = array<i64: 16>, scalar_prefetch = 1 : i64, scratch_operands = 0 : i64, tpu.core_type = #tpu.core_type<tc>, window_params = [{transform_indices = @transform_0, window_bounds = array<i64: 1, 1, 2048>}, {transform_indices = @transform_1, window_bounds = array<i64: 1, 1, 2048>}]} {
    %c0 = arith.constant 0 : index
    %c0_0 = arith.constant 0 : index
    %c0_1 = arith.constant 0 : index
    %0 = vector.load %arg2[%c0, %c0_0, %c0_1] : memref<1x1x2048xf32, #tpu.memory_space<vmem>>, vector<1x1x2048xf32>
    %c0_2 = arith.constant 0 : index
    %c0_3 = arith.constant 0 : index
    %c0_4 = arith.constant 0 : index
    %1 = vector.load %arg3[%c0_2, %c0_3, %c0_4] : memref<1x1x2048xf32, #tpu.memory_space<vmem>>, vector<1x1x2048xf32>
    tpu.vector_store %arg3[%c0_2, %c0_3, %c0_4], %0 {strides = array<i32>} : memref<1x1x2048xf32, #tpu.memory_space<vmem>>, vector<1x1x2048xf32>,
    return
  }
  func.func @transform_0(%arg0: i32, %arg1: memref<16xi32, #tpu.memory_space<smem>>) -> (i32, i32, i32) {
    %0 = arith.index_cast %arg0 : i32 to index
    %1 = memref.load %arg1[%0] : memref<16xi32, #tpu.memory_space<smem>>
    %c0_i32 = arith.constant 0 : i32
    %c0_i32_0 = arith.constant 0 : i32
    %c0_i32_1 = arith.constant 0 : i32
    return %1, %c0_i32, %c0_i32_0 : i32, i32, i32
  }
  func.func @transform_1(%arg0: i32, %arg1: memref<16xi32, #tpu.memory_space<smem>>) -> (i32, i32, i32) {
    %c0_i32 = arith.constant 0 : i32
    %c0_i32_0 = arith.constant 0 : i32
    %c0_i32_1 = arith.constant 0 : i32
    return %arg0, %c0_i32, %c0_i32_0 : i32, i32, i32
  }
}

</mosaic_0001>

<bundles_post_ra>
// kernel: tpu_custom_call.1
= control target key start
LH: loop header
LB: loop body
LE: loop exit
PB: predicated region body
PF: predicated region fallthrough
CT: control target
= control target key end

     0   :  { %s450_s9 = smov [#allocation3]   ;;  %s649_s0 = inlined_call_operand.hbm [shape: s32[16], index: 0, kind: input, shape index: {}]   ;;  %s650_s1 = inlined_call_operand.hbm [shape: f32[129,1,2048], index: 1, kind: input, shape index: {}]   ;;  %s651_s2 = inlined_call_operand.hbm [shape: f32[16,1,2048], index: 2, kind: output, shape index: {}]  }
   0x1   :  { %8 = dma.hbm_to_smem %s649_s0, 16, %s450_s9, [#allocation2] }
   0x2   :  { %412 = dma.done.wait [#allocation2], 16 }
   0x3   :  { %413 = vsyncadd [#allocation2], 4294967280 }
   0x4   :  { %10 = sfence }
   0x5   :  { %11 = vsyncpa [#allocation5], 0 }
   0x6   :  { %13 = vsyncpa [#allocation5 + $0x1], 0 }
   0x7   :  { %14 = vsyncpa [#allocation6], 0 }
   0x8   :  { %16 = vsyncpa [#allocation6 + $0x1], 0  ;;  %s471_s12 = smov 0   ;;  %s473_s13 = smov 0  }
   0x9   :  { %s475_s14 = smov 0   ;;  %s477_s15 = smov 0  }
   0xa   :  { %s479_s16 = smov 0   ;;  %s481_s17 = smov 0  }
   0xb   :  { %s483_s0 = smov 0  }
   0xc LB: > { %s505_s18 = sadd.s32 4294967295, %s448_s0   ;;  %s231_s19 = sadd.s32 4294967294, %s448_s0   ;;  %s448_s0 = sphi %s483_s0, %s670_s0   ;;  %s444_s17 = sphi %s481_s17, %s669_s17   ;;  %s440_s16 = sphi %s479_s16, %s668_s16   ;;  %s436_s15 = sphi %s477_s15, %s667_s15   ;;  %s432_s14 = sphi %s475_s14, %s666_s14   ;;  %s428_s13 = sphi %s473_s13, %s665_s13   ;;  %s424_s12 = sphi %s471_s12, %s664_s12  }
   0xd   : > { %s509_s20 = sadd.s32 1, %s448_s0   ;;  %s26_s21 = sld [smem:[#allocation3 + %s448_s0]] }
   0xe   : > { %s27_s22 = sld [smem:[#allocation3 + %s509_s20]]  ;;  %s31_s23 = sadd.s32 1, %s444_s17 }
   0xf   : > { %p38_p0 = scmp.ne.s32.totalorder %s444_s17, %s440_s16  ;;  %p39_p1 = scmp.eq.s32.totalorder %s448_s0, 0 }
  0x10   : > { %p44_p2 = scmp.ne.s32.totalorder %s440_s16, %s436_s15  ;;  %p45_p3 = scmp.eq.s32.totalorder %s505_s18, 0 }
  0x11   : > { %p519_p4 = por %p39_p1, %p38_p0  ;;  %s54_s25 = ssub.s32 %s448_s0, %s509_s20 }
  0x12   : > { %p525_p5 = por %p45_p3, %p44_p2  ;;  %p55_p6 = scmp.eq.s32.totalorder %s54_s25, 0 }
  0x13   : > { %s57_s27 = sadd.s32 1, %s432_s14  ;;  %p67_p7 = scmp.ne.s32.totalorder %s432_s14, %s428_s13 }
  0x14   : > { %s655_s26 = scalar_select %p525_p5, 1, 0 }
  0x15   : > { %s28_s28 = ssub.s32 %s26_s21, %s27_s22  ;;  %p68_p8 = scmp.eq.s32.totalorder %s505_s18, 15 }
  0x16   : > { %p29_p9 = scmp.eq.s32.totalorder %s28_s28, 0  ;;  %p73_p10 = scmp.ne.s32.totalorder %s428_s13, %s424_s12 }
  0x17   : > { %s536_s29 = scalar_select %p55_p6, %s432_s14, %s57_s27  }
  0x18   : > { %s539_s30 = scalar_select %p29_p9, %s444_s17, %s31_s23  }
  0x19   : > { %p541_p11 = por %p68_p8, %p67_p7  ;;  %p74_p12 = scmp.eq.s32.totalorder %s231_s19, 15 }
  0x1a   : > { %p263_p13 = scmp.lt.s32.totalorder %s448_s0, 16  ;;  %s94_s5 = sand.u32 1, %s444_s17  }
  0x1b   : > { %s656_s3 = scalar_select %p541_p11, 1, 0 }
  0x1c   : > { %p546_p0 = por %p74_p12, %p73_p10  ;;  %s234_s6 = sshll.u32 %s94_s5, 4 }
  0x1d   : > { %p553_p1 = pnand %p263_p13, %p519_p4  ;;  %p237_p2 = scmp.ge.s32.totalorder %s448_s0, 1 }
  0x1e   : > { %s657_s4 = scalar_select %p546_p0, 1, 0 }
  0x1f   : > { %s247_s8 = scalar_select %p519_p4, [#allocation3], [#allocation8] }
  0x20   : > { %s248_s9 = scalar_select %p519_p4, %s448_s0, 0 }
  0x21   : > { %s672_s8 = smov (!%p263_p13, %s247_s8), [#allocation9]  ;;  %p112_p3 = scmp.lt.s32.totalorder %s448_s0, 17 }
  0x22   : > { %s674_s9 = smov (!%p263_p13, %s248_s9), 0  ;;  %s98_s11 = scalar_lea.vmem [#allocation4], %s234_s6 }
  0x23   : > { %s99_s10 = sld [smem:[%s672_s8 + %s674_s9]]  ;;  %s107_s15 = sshll.u32 %s98_s11, 4  ;;  %s568_s15 = int_to_ptr.vmem [resolvable:$true] %s107_s15 }
  0x24   : > { %p564_p6 = pnand %p237_p2, %p112_p3  ;;  %s95_s25 = scalar_lea.sflag [#allocation5], %s94_s5 }
  0x25   : > { %p332_p7 = pneg %p553_p1  ;;  %s335_s8 = scalar_lea.hbm %s650_s1, 33024 }
  0x26   : > { %s659_s19 = scalar_select %p564_p6, 1, 0 }
  0x29   : > { %s245_s21 = sshll.u32 %s99_s10, 8 }
  0x2a   : > { %s105_s24 = scalar_lea.hbm %s650_s1, %s245_s21 }
  0x2b   : > { %s330_s27 = scalar_lea.hbm %s105_s24, 256  ;;  %p336_p10 = scmp.lt.s32.totalorder %s105_s24, %s650_s1 }
  0x2c   : > { %p331_p4 = scmp.ne.s32.totalorder %s105_s24, %s330_s27  ;;  %p337_p12 = scmp.lt.s32.totalorder %s335_s8, %s330_s27 }
  0x2e   : > { %p333_p8 = pnand %p332_p7, %p331_p4  ;;  %p338_p13 = por %p337_p12, %p336_p10 }
  0x30   : > { %p334_p9 = pneg %p333_p8 }
  0x32   : > { %p339_p2 = pnand %p338_p13, %p334_p9 }
  0x34   : > { %342 = shalt.err (!%p339_p2)
}
  0x35   : > { %s343_s5 = scalar_lea.vmem %s568_s15, 256  ;;  %s451_s10 = smov [#allocation4]  }
  0x36   : > { %p344_p3 = scmp.ne.s32.totalorder %s568_s15, %s343_s5  ;;  %s348_s21 = sshll.u32 %s451_s10, 4  ;;  %s349_s21 = int_to_ptr.vmem [resolvable:$false] %s348_s21 }
  0x37   : > { %s350_s22 = scalar_lea.vmem %s349_s21, 512  ;;  %p351_p8 = scmp.lt.s32.totalorder %s568_s15, %s349_s21 }
  0x38   : > { %p346_p0 = pnand %p344_p3, %p332_p7  ;;  %p352_p11 = scmp.lt.s32.totalorder %s350_s22, %s343_s5 }
  0x3a   : > { %p347_p4 = pneg %p346_p0  ;;  %p353_p5 = por %p352_p11, %p351_p8 }
  0x3c   : > { %p354_p6 = pnand %p353_p5, %p347_p4 }
  0x3e   : > { %357 = shalt.err (!%p354_p6)
}
  0x3f   : > { %258 = dma.hbm_to_vmem [thread:$0]  (!%p553_p1), %s105_s24, 256, %s568_s15, %s95_s25  }
  0x40   : > { %p660_p9 = scmp.ne.s32.totalorder %s659_s19, 0 }
  0x41   : > { %s118_s23 = sand.u32 (!%p660_p9), 1, %s440_s16   ;;  %p661_p0 = scmp.ne.s32.totalorder (!%p660_p9), %s655_s26, 0 }
  0x42   : > { %116 = sbr.rel (%p660_p9) target bundleno = 97 (0x61), region = 24  ;;  %s238_s27 = sshll.u32 (!%p660_p9), %s118_s23, 4 }
  0x43   : > { %s119_s28 = scalar_lea.sflag (!%p660_p9), [#allocation5], %s118_s23  ;;  %s122_s6 = scalar_lea.vmem (!%p660_p9), [#allocation4], %s238_s27 }
  0x47   : > { %415 = dma.done.wait (%p661_p0), %s119_s28, 256  }
  0x48   : > { %417 = vsyncadd (%p661_p0), %s119_s28, 4294967040  ;;  %s138_s7 = sand.u32 1, %s428_s13   ;;  %s246_s19 = sshll.u32 %s505_s18, 8  ;;  %v142_v0 = vld [vmem:[%s122_s6] sm:$0xff]  ;;  %v143_v1 = vld [vmem:[%s122_s6 + $0x8] sm:$0xff] }
  0x49   : > { %s239_s8 = sshll.u32 %s138_s7, 4  ;;  %s601_s11 = scalar_lea.hbm %s651_s2, %s246_s19 }
  0x4a   : > { %s140_s15 = scalar_lea.vmem [#allocation7], %s239_s8  ;;  %s147_s26 = scalar_lea.sflag [#allocation6], %s138_s7 }
  0x4b   : > { %s161_s24 = sshll.u32 %s140_s15, 4  ;;  %144 = vst [vmem:[%s140_s15] sm:$0xff] %v142_v0  ;;  %145 = vst [vmem:[%s140_s15 + $0x8] sm:$0xff] %v143_v1  ;;  %p662_p11 = scmp.ne.s32.totalorder %s656_s3, 0  ;;  %s596_s24 = int_to_ptr.vmem [resolvable:$true] %s161_s24 }
  0x4c   : > { %s358_s5 = scalar_lea.vmem %s596_s24, 256  ;;  %s452_s18 = smov [#allocation7]  }
  0x4d   : > { %p359_p5 = scmp.ne.s32.totalorder %s596_s24, %s358_s5  ;;  %s362_s10 = sshll.u32 %s452_s18, 4  ;;  %s363_s10 = int_to_ptr.vmem [resolvable:$false] %s362_s10 }
  0x4e   : > { %s364_s21 = scalar_lea.vmem %s363_s10, 512  ;;  %p365_p7 = scmp.lt.s32.totalorder %s596_s24, %s363_s10 }
  0x4f   : > { %p360_p1 = pnand %p359_p5, %p662_p11  ;;  %p366_p10 = scmp.lt.s32.totalorder %s364_s21, %s358_s5 }
  0x51   : > { %p361_p6 = pneg %p360_p1  ;;  %p367_p12 = por %p366_p10, %p365_p7 }
  0x53   : > { %p368_p13 = pnand %p367_p12, %p361_p6 }
  0x55   : > { %371 = shalt.err (!%p368_p13)
}
  0x56   : > { %s372_s22 = scalar_lea.hbm %s601_s11, 256  ;;  %s376_s28 = scalar_lea.hbm %s651_s2, 4096 }
  0x57   : > { %p373_p2 = scmp.ne.s32.totalorder %s601_s11, %s372_s22  ;;  %p377_p8 = scmp.lt.s32.totalorder %s601_s11, %s651_s2 }
  0x58   : > { %p378_p9 = scmp.lt.s32.totalorder %s376_s28, %s372_s22 }
  0x59   : > { %p374_p3 = pnand %p373_p2, %p662_p11 }
  0x5a   : > { %p379_p0 = por %p378_p9, %p377_p8 }
  0x5b   : > { %p375_p4 = pneg %p374_p3 }
  0x5d   : > { %p380_p5 = pnand %p379_p0, %p375_p4 }
  0x5f   : > { %383 = shalt.err (!%p380_p5)
}
  0x60   : > { %251 = dma.vmem_to_hbm [thread:$0]  (%p662_p11), %s596_s24, 256, %s601_s11, %s147_s26  }
  0x61 PF: > { %p264_p1 = scmp.ge.s32.totalorder %s448_s0, 2  ;;  %s173_s8 = sand.u32 1, %s424_s12  }
  0x62   : > { %p663_p6 = scmp.ne.s32.totalorder %s657_s4, 0  ;;  %s174_s15 = scalar_lea.sflag [#allocation6], %s173_s8 }
  0x64   : > { %p260_p7 = pnand %p264_p1, %p663_p6 }
  0x66   : > { %p261_p10 = pneg %p260_p7 }
  0x68   : > { %419 = dma.done.wait (%p261_p10), %s174_s15, 256  }
  0x69   : > { %421 = vsyncadd (%p261_p10), %s174_s15, 4294967040  ;;  %p19_p11 = scmp.ge.s32.totalorder %s509_s20, 18   ;;  %s664_s12 = smov %s428_s13 }
  0x6a   : > { %s665_s13 = smov %s432_s14  ;;  %s666_s14 = smov %s536_s29 }
  0x6b   : > { %s667_s15 = smov %s440_s16  ;;  %s668_s16 = smov %s444_s17 }
  0x6c   : > { %s669_s17 = smov %s539_s30  ;;  %s670_s0 = smov %s509_s20 }
  0x6d   :  { %21 = sbr.rel (!%p19_p11) target bundleno = 12 (0xc), region = 69 }
  0x72   :  { %179 = vsyncpa [#allocation5], 1 }
  0x73   :  { %181 = vsyncpa [#allocation5 + $0x1], 1 }
  0x74   :  { %182 = vsyncpa [#allocation6], 1 }
  0x75   :  { %184 = vsyncpa [#allocation6 + $0x1], 1 }

</bundles_post_ra>
